<compile_context>
chip_gen: v6e
topology: v6e:2x2x1
jax: 0.10.0
libtpu: 0.0.40
codegen_flags: <defaults>
</compile_context>

<pallas_src>
import jax
import jax.numpy as jnp
from jax.experimental import pallas as pl
from jax.experimental.pallas import tpu as pltpu


def _round_up(x, m):
    return ((x + m - 1) // m) * m


def weighted_mse_loss(pred, target, sample_weights, feature_weights, *,
                      max_tile_rows=None):
    """pred/target: (B, F); sample_weights: (B,); feature_weights: (F,)."""
    B, F = pred.shape
    assert target.shape == (B, F)
    assert sample_weights.shape == (B,)
    assert feature_weights.shape == (F,)

    itemsize = jnp.dtype(pred.dtype).itemsize
    f_lane = _round_up(F, 128)          # lane-padded width actually occupied in VMEM

    # --- Tile sizing by bytes, not rows --------------------------------------
    # Per batch row, per pipeline buffer:
    #   pred tile + target tile     : 2 * f_lane * itemsize
    #   sample-weight row, (1,TB) lane-dense block padded to 8 sublanes of f32 : 32 B
    # BlockSpec double-buffers each stream (x2).
    stream_budget = 16 * 1024 * 1024
    per_row_bytes = 2 * (2 * f_lane * itemsize + 8 * 4)
    tb_cap = max(8, (stream_budget // per_row_bytes) // 8 * 8)
    if max_tile_rows is not None:
        tb_cap = min(tb_cap, max(8, (max_tile_rows // 8) * 8))
    TB = min(_round_up(B, 8), tb_cap)
    num_tiles = pl.cdiv(B, TB)
    padded_rows = num_tiles * TB
    need_mask = (B % TB) != 0
    # TODO(synk): for F so large that even TB=8 blows the VMEM budget, add an F
    # (lane) grid axis with a scratch accumulator; typical feature dims fit.
    # TODO(synk): for F < 128 a wrapper-side lane-densified repack (128/F rows
    # per vreg row) would cut VPU/VMEM inflation 128/F-fold; the f_lane term in
    # the budget above already accounts for that inflation when sizing TB.

    # VMEM limit that fits v7x (64 MiB) as well as v5e/v6e (128 MiB).
    try:
        phys_vmem = pltpu.get_tpu_info().vmem_capacity_bytes
    except Exception:
        phys_vmem = 64 * 1024 * 1024
    vmem_limit = min(48 * 1024 * 1024, (phys_vmem * 3) // 4)

    # Feature weights: small lane-dense resident (1, F) row.
    fw = feature_weights.reshape(1, F).astype(jnp.float32)

    # Sample weights: pad ONLY this tiny vector, lay it out lane-dense, one
    # (1, TB) row per tile. Padded entries are 0; combined with the in-kernel
    # row mask (applied to per_row BEFORE the multiply) garbage rows of the
    # last tile contribute exactly 0 (avoids 0 * NaN).
    sw = sample_weights.astype(jnp.float32)
    if padded_rows != B:
        sw = jnp.pad(sw, (0, padded_rows - B))
    sw = sw.reshape(num_tiles, 1, TB)

    def kernel(pred_ref, target_ref, fw_ref, sw_ref, out_ref):
        # Upcast in-kernel: HBM traffic stays at the native dtype width.
        diff = pred_ref[...].astype(jnp.float32) - target_ref[...].astype(jnp.float32)
        sq = diff * diff                                   # (TB, F)  VPU
        fwq = sq * fw_ref[...]                             # (TB, F) * (1, F) broadcast
        per_row = jnp.sum(fwq, axis=1, keepdims=True)      # (TB, 1)  XLU lane reduce
        if need_mask:
            i = pl.program_id(0)
            row_ids = jax.lax.broadcasted_iota(jnp.int32, (TB, 1), 0) + i * TB
            per_row = jnp.where(row_ids < B, per_row, 0.0)  # kill garbage rows
        # Fold the lane-dense sample weights with a tiny MXU dot (MXU is idle);
        # HIGHEST precision keeps the f32 accuracy of the reference.
        partial = jnp.dot(sw_ref[0], per_row,
                          precision=jax.lax.Precision.HIGHEST,
                          preferred_element_type=jnp.float32)   # (1, 1)
        # Lane-dense, unmasked 128-lane writeback of this tile's partial sum.
        out_ref[...] = jnp.broadcast_to(partial.reshape(1, 1, 1), out_ref.shape)

    partials = pl.pallas_call(
        kernel,
        out_shape=jax.ShapeDtypeStruct((num_tiles, 1, 128), jnp.float32),
        grid=(num_tiles,),
        in_specs=[
            pl.BlockSpec((TB, F), lambda i: (i, 0)),        # pred tile (native dtype)
            pl.BlockSpec((TB, F), lambda i: (i, 0)),        # target tile (native dtype)
            pl.BlockSpec((1, F), lambda i: (0, 0)),         # feature weights (resident)
            pl.BlockSpec((1, 1, TB), lambda i: (i, 0, 0)),  # sample weights, lane-dense
        ],
        out_specs=pl.BlockSpec((1, 1, 128), lambda i: (i, 0, 0)),
        compiler_params=pltpu.CompilerParams(
            dimension_semantics=("parallel",),              # shard tiles across TCs (v7x)
            vmem_limit_bytes=vmem_limit,
        ),
        cost_estimate=pl.CostEstimate(
            flops=4 * B * F + 2 * padded_rows,
            transcendentals=0,
            bytes_accessed=2 * B * F * itemsize + 4 * (F + padded_rows)
            + num_tiles * 128 * 4,
        ),
    )(pred, target, fw, sw)

    # Every lane of each tile's output row carries the same partial sum, so a
    # dense sum plus a single fused 1/(128*B*F) scale replaces the old strided
    # [:, 0, 0] gather; both means use the ORIGINAL B (masked rows contributed 0).
    return partials.sum() * (1.0 / (128.0 * B * F))


def weighted_mse_loss_ref(pred, target, sample_weights, feature_weights):
    squared_error = (pred.astype(jnp.float32) - target.astype(jnp.float32)) ** 2
    feature_weighted = squared_error * feature_weights[None, :].astype(jnp.float32)
    sample_weighted = jnp.mean(feature_weighted, axis=1) * sample_weights.astype(jnp.float32)
    return jnp.mean(sample_weighted)


if __name__ == "__main__":
    key = jax.random.PRNGKey(0)

    def make_case(k, B, F, dtype=jnp.float32):
        k1, k2, k3 = jax.random.split(k, 3)
        pred = jax.random.normal(k1, (B, F), dtype=jnp.float32).astype(dtype)
        target = jax.random.normal(k2, (B, F), dtype=jnp.float32).astype(dtype)
        sw = jax.random.uniform(k3, (B,), dtype=jnp.float32)
        fw = jnp.linspace(0.5, 1.5, F, dtype=jnp.float32)   # module "parameter"
        return pred, target, sw, fw

    # Case 1: shapes implied by the module (batch=8, num_features=32), f32.
    k, key = jax.random.split(key)
    pred, target, sw, fw = make_case(k, 8, 32)
    loss = jax.block_until_ready(weighted_mse_loss(pred, target, sw, fw))
    ref = weighted_mse_loss_ref(pred, target, sw, fw)
    assert jnp.allclose(loss, ref, rtol=1e-5, atol=1e-6), (loss, ref)

    # Case 2: ragged batch (exercises the in-kernel last-tile row mask, no pad).
    k, key = jax.random.split(key)
    pred, target, sw, fw = make_case(k, 10, 32)
    loss = jax.block_until_ready(weighted_mse_loss(pred, target, sw, fw))
    ref = weighted_mse_loss_ref(pred, target, sw, fw)
    assert jnp.allclose(loss, ref, rtol=1e-5, atol=1e-6), (loss, ref)

    # Case 3: multi-tile + ragged last tile (small forced TB to exercise the
    # streaming/partial-sum path at a small shape).
    k, key = jax.random.split(key)
    pred, target, sw, fw = make_case(k, 20, 32)
    loss = jax.block_until_ready(
        weighted_mse_loss(pred, target, sw, fw, max_tile_rows=8))
    ref = weighted_mse_loss_ref(pred, target, sw, fw)
    assert jnp.allclose(loss, ref, rtol=1e-5, atol=1e-6), (loss, ref)

    # Case 4: bf16 inputs (exercises the in-kernel upcast path).
    k, key = jax.random.split(key)
    pred, target, sw, fw = make_case(k, 16, 32, dtype=jnp.bfloat16)
    loss = jax.block_until_ready(weighted_mse_loss(pred, target, sw, fw))
    ref = weighted_mse_loss_ref(pred, target, sw, fw)
    assert jnp.allclose(loss, ref, rtol=1e-5, atol=1e-5), (loss, ref)

    print("KERNEL_OK")
</pallas_src>

<mosaic_0001>
module attributes {stable_mosaic.version = 11 : i64} {
  func.func @kernel(%arg0: i32, %arg1: memref<8x32xf32, #tpu.memory_space<vmem>>, %arg2: memref<8x32xf32, #tpu.memory_space<vmem>>, %arg3: memref<1x32xf32, #tpu.memory_space<vmem>>, %arg4: memref<1x1x8xf32, #tpu.memory_space<vmem>>, %arg5: memref<1x1x128xf32, #tpu.memory_space<vmem>>) attributes {dimension_semantics = [#tpu.dimension_semantics<parallel>], iteration_bounds = array<i64: 1>, scalar_prefetch = 0 : i64, scratch_operands = 0 : i64, tpu.core_type = #tpu.core_type<tc>, window_params = [{transform_indices = @transform_0, window_bounds = array<i64: 8, 32>}, {transform_indices = @transform_1, window_bounds = array<i64: 8, 32>}, {pipeline_mode = #tpu.pipeline_mode<synchronous>, transform_indices = @transform_2, window_bounds = array<i64: 1, 32>}, {transform_indices = @transform_3, window_bounds = array<i64: 1, 1, 8>}, {transform_indices = @transform_4, window_bounds = array<i64: 1, 1, 128>}]} {
    %c0 = arith.constant 0 : index
    %c0_0 = arith.constant 0 : index
    %0 = vector.load %arg1[%c0, %c0_0] : memref<8x32xf32, #tpu.memory_space<vmem>>, vector<8x32xf32>
    %c0_1 = arith.constant 0 : index
    %c0_2 = arith.constant 0 : index
    %1 = vector.load %arg2[%c0_1, %c0_2] : memref<8x32xf32, #tpu.memory_space<vmem>>, vector<8x32xf32>
    %2 = arith.subf %0, %1 : vector<8x32xf32>
    %3 = arith.mulf %2, %2 : vector<8x32xf32>
    %c0_3 = arith.constant 0 : index
    %c0_4 = arith.constant 0 : index
    %4 = vector.load %arg3[%c0_3, %c0_4] : memref<1x32xf32, #tpu.memory_space<vmem>>, vector<1x32xf32>
    %5 = vector.broadcast %4 : vector<1x32xf32> to vector<8x32xf32>
    %6 = arith.mulf %3, %5 : vector<8x32xf32>
    %cst = arith.constant dense<0.000000e+00> : vector<8xf32>
    %7 = vector.multi_reduction <add>, %6, %cst [1] : vector<8x32xf32> to vector<8xf32>
    %8 = vector.shape_cast %7 : vector<8xf32> to vector<8x1xf32>
    %c0_5 = arith.constant 0 : index
    %c0_6 = arith.constant 0 : index
    %c0_7 = arith.constant 0 : index
    %9 = vector.load %arg4[%c0_5, %c0_6, %c0_7] : memref<1x1x8xf32, #tpu.memory_space<vmem>>, vector<1x1x8xf32>
    %10 = vector.shape_cast %9 : vector<1x1x8xf32> to vector<1x8xf32>
    %cst_8 = arith.constant dense<0.000000e+00> : vector<1x1xf32>
    %11 = tpu.matmul %10, %8, %cst_8 {dimension_numbers = #tpu.dot_dimension_numbers<[1], [0], [0], [1], [0, 0, 1, 1], [], []>, precision = #tpu.contract_precision<fp32>} : vector<1x8xf32>, vector<8x1xf32>, vector<1x1xf32> -> vector<1x1xf32>
    %12 = vector.shape_cast %11 : vector<1x1xf32> to vector<1x1x1xf32>
    %13 = vector.shape_cast %12 : vector<1x1x1xf32> to vector<1x1x1xf32>
    %14 = vector.broadcast %13 : vector<1x1x1xf32> to vector<1x1x128xf32>
    %c0_9 = arith.constant 0 : index
    %c0_10 = arith.constant 0 : index
    %c0_11 = arith.constant 0 : index
    %15 = vector.load %arg5[%c0_9, %c0_10, %c0_11] : memref<1x1x128xf32, #tpu.memory_space<vmem>>, vector<1x1x128xf32>
    tpu.vector_store %arg5[%c0_9, %c0_10, %c0_11], %14 {strides = array<i32>} : memref<1x1x128xf32, #tpu.memory_space<vmem>>, vector<1x1x128xf32>,
    return
  }
  func.func @transform_0(%arg0: i32) -> (i32, i32) {
    %c0_i32 = arith.constant 0 : i32
    %c0_i32_0 = arith.constant 0 : i32
    return %arg0, %c0_i32 : i32, i32
  }
  func.func @transform_1(%arg0: i32) -> (i32, i32) {
    %c0_i32 = arith.constant 0 : i32
    %c0_i32_0 = arith.constant 0 : i32
    return %arg0, %c0_i32 : i32, i32
  }
  func.func @transform_2(%arg0: i32) -> (i32, i32) {
    %c0_i32 = arith.constant 0 : i32
    %c0_i32_0 = arith.constant 0 : i32
    %c0_i32_1 = arith.constant 0 : i32
    return %c0_i32, %c0_i32_0 : i32, i32
  }
  func.func @transform_3(%arg0: i32) -> (i32, i32, i32) {
    %c0_i32 = arith.constant 0 : i32
    %c0_i32_0 = arith.constant 0 : i32
    %c0_i32_1 = arith.constant 0 : i32
    return %arg0, %c0_i32, %c0_i32_0 : i32, i32, i32
  }
  func.func @transform_4(%arg0: i32) -> (i32, i32, i32) {
    %c0_i32 = arith.constant 0 : i32
    %c0_i32_0 = arith.constant 0 : i32
    %c0_i32_1 = arith.constant 0 : i32
    return %arg0, %c0_i32, %c0_i32_0 : i32, i32, i32
  }
}

</mosaic_0001>

<bundles_post_ra>
// kernel: tpu_custom_call.1
= control target key start
LH: loop header
LB: loop body
LE: loop exit
PB: predicated region body
PF: predicated region fallthrough
CT: control target
= control target key end

     0   :  { %9 = vsyncpa [#allocation3], 0  ;;  %s699_s0 = inlined_call_operand.hbm [shape: f32[8,32], index: 0, kind: input, shape index: {}]   ;;  %s700_s1 = inlined_call_operand.hbm [shape: f32[8,32], index: 1, kind: input, shape index: {}]   ;;  %s701_s2 = inlined_call_operand.vmem [shape: f32[1,32], index: 2, kind: input, shape index: {}]   ;;  %s702_s3 = inlined_call_operand.vmem [shape: f32[1,1,8], index: 3, kind: input, shape index: {}]   ;;  %s703_s4 = inlined_call_operand.hbm [shape: f32[1,1,128], index: 4, kind: output, shape index: {}]  }
   0x1   :  { %10 = vsyncpa [#allocation6], 0 }
   0x2   :  { %11 = vsyncpa [#allocation4], 0  ;;  %s647_s15 = smov [#allocation2]   ;;  %s648_s17 = smov [#allocation5]  }
   0x3   :  { %s18_s16 = sshll.u32 %s647_s15, 4  ;;  %s28_s18 = sshll.u32 %s648_s17, 4  ;;  %s19_s16 = int_to_ptr.vmem [resolvable:$true] %s18_s16  ;;  %s29_s18 = int_to_ptr.vmem [resolvable:$true] %s28_s18 }
   0x4   :  { %s589_s19 = scalar_lea.vmem %s19_s16, 128  ;;  %p594_p1 = scmp.lt.s32.totalorder %s19_s16, %s19_s16 }
   0x5   :  { %p590_p0 = scmp.ne.s32.totalorder %s19_s16, %s589_s19  ;;  %p595_p2 = scmp.lt.s32.totalorder %s589_s19, %s589_s19 }
   0x7   :  { %p596_p3 = por %p595_p2, %p594_p1 }
   0x9   :  { %p597_p4 = pnand %p596_p3, %p590_p0 }
   0xb   :  { %600 = shalt.err (!%p597_p4)
}
   0xc   :  { %21 = dma.hbm_to_vmem [thread:$0]  %s699_s0, 128, %s19_s16, [#allocation3]  }
   0xd   :  { %s609_s22 = scalar_lea.vmem %s29_s18, 128  ;;  %p614_p6 = scmp.lt.s32.totalorder %s29_s18, %s29_s18 }
   0xe   :  { %p610_p5 = scmp.ne.s32.totalorder %s29_s18, %s609_s22  ;;  %p615_p7 = scmp.lt.s32.totalorder %s609_s22, %s609_s22 }
  0x10   :  { %p616_p8 = por %p615_p7, %p614_p6 }
  0x12   :  { %p617_p9 = pnand %p616_p8, %p610_p5 }
  0x14   :  { %620 = shalt.err (!%p617_p9)
}
  0x15   :  { %31 = dma.hbm_to_vmem [thread:$0]  %s700_s1, 128, %s29_s18, [#allocation6]  }
  0x16   :  { %641 = dma.done.wait [#allocation3], 128  }
  0x17   :  { %642 = vsyncadd [#allocation3], 4294967168 }
  0x18   :  { %643 = dma.done.wait [#allocation6], 128  }
  0x19   :  { %644 = vsyncadd [#allocation6], 4294967168  ;;  %v42_v0 = vld [vmem:[#allocation2] sm:$0xff]  ;;  %v43_v1 = vld [vmem:[#allocation5] sm:$0xff]  ;;  %vm54_vm0 = vcmask 261120   ;;  %v649_v7 = vmov 0.0  }
  0x1a   :  { %v44_v2 = vsub.f32 %v42_v0, %v43_v1  ;;  %v531_v3 = vld [vmem:[%s701_s2] ss:$0 sm:$0xff]  ;;  %544 = vmatprep.subr.mxu0 %v649_v7  ;;  %549 = vmatprep.subr.mxu1 %v649_v7  ;;  %vm650_vm1 = vmmov 0   ;;  %vm59_vm2 = vcmask 64512   ;;  %v651_v21 = vmov 0   ;;  %s652_s2 = smov [#allocation7]  }
  0x1b   :  { %546 = vmatprep.mubr.msk.f32.mxu0 %vm650_vm1, %v649_v7  ;;  %551 = vmatprep.mubr.msk.f32.mxu1 %vm650_vm1, %v649_v7  ;;  %v58_v8 = vld [vmem:[%s702_s3] sm:$0x1]  ;;  %s521_s3 = sshll.u32 %s652_s2, 4  ;;  %s522_s3 = int_to_ptr.vmem [resolvable:$true] %s521_s3 }
  0x1c   :  { %v45_v4 = vmul.f32 %v44_v2, %v44_v2  ;;  %v61_v9 = vsel %vm59_vm2, %v58_v8, 0  ;;  %580 = vset.pattern.permute.xlu0 %v651_v21  ;;  %s621_s27 = scalar_lea.vmem %s522_s3, 16  ;;  %s625_s28 = scalar_lea.vmem %s522_s3, 32 }
  0x1d   :  { %v129_v10 = vand.u32 4294901760, %v61_v9  ;;  %p622_p10 = scmp.ne.s32.totalorder %s522_s3, %s621_s27  ;;  %p626_p11 = scmp.lt.s32.totalorder %s522_s3, %s522_s3 }
  0x1e   :  { %v53_v5 = vmul.f32 %v531_v3, %v45_v4  ;;  %p627_p12 = scmp.lt.s32.totalorder %s625_s28, %s621_s27 }
  0x1f   :  { %v130_v11 = vsub.f32 %v61_v9, %v129_v10 }
  0x20   :  { %v55_v6 = vsel %vm54_vm0, %v53_v5, 0.0  ;;  %p628_p13 = por %p627_p12, %p626_p11 }
  0x21   :  { %56 = vadd.xlane.f32.xlu0 %v55_v6  ;;  %v131_v12 = vand.u32 4294901760, %v130_v11 }
  0x22   :  { %p629_p0 = pnand %p628_p13, %p622_p10 }
  0x23   :  { %v132_v13 = vsub.f32 %v130_v11, %v131_v12 }
  0x25   :  { %v133_v15 = vand.u32 4294901760, %v132_v13 }
  0xaa   :  { %v57_v14 = vpop.xlane.xlu0 %56 }
  0xab   :  { %v94_v16 = vand.u32 4294901760, %v57_v14 }
  0xad   :  { %v171_v17 = vsub.f32 %v57_v14, %v94_v16  ;;  %545 = vmatpush3.msra.mxu0 %v94_v16 }
  0xae   :  { %547 = vmatmul.mubr.f32.vlgmr.msra.gmra.mxu0 %v133_v15  ;;  %554 = vmatprep.subr.mxu0 %v649_v7 }
  0xaf   :  { %v172_v18 = vand.u32 4294901760, %v171_v17  ;;  %555 = vmatpush3.msra.mxu0 %v171_v17  ;;  %556 = vmatprep.mubr.msk.f32.mxu0 %vm650_vm1, %v649_v7 }
  0xb0   :  { %564 = vmatprep.subr.mxu0 %v649_v7 }
  0xb1   :  { %v173_v19 = vsub.f32 %v171_v17, %v172_v18 }
  0xb2   :  { %557 = vmatmul.mubr.f32.vlgmr.msra.gmra.mxu0 %v130_v11 }
  0xb3   :  { %565 = vmatpush3.msra.mxu0 %v172_v18  ;;  %v174_v20 = vand.u32 4294901760, %v173_v19  ;;  %566 = vmatprep.mubr.msk.f32.mxu0 %vm650_vm1, %v649_v7 }
  0xb5   :  { %550 = vmatpush3.msra.mxu1 %v174_v20 }
  0xb6   :  { %552 = vmatmul.mubr.f32.vlgmr.msra.gmra.mxu1 %v129_v10  ;;  %559 = vmatprep.subr.mxu1 %v649_v7 }
  0xb7   :  { %560 = vmatpush3.msra.mxu1 %v94_v16  ;;  %561 = vmatprep.mubr.msk.f32.mxu1 %vm650_vm1, %v649_v7 }
  0xb8   :  { %569 = vmatprep.subr.mxu1 %v649_v7  ;;  %567 = vmatmul.mubr.f32.vlgmr.msra.gmra.mxu0 %v129_v10 }
  0xba   :  { %562 = vmatmul.mubr.f32.vlgmr.msra.gmra.mxu1 %v131_v12 }
  0xbb   :  { %570 = vmatpush3.msra.mxu1 %v94_v16  ;;  %571 = vmatprep.mubr.msk.f32.mxu1 %vm650_vm1, %v649_v7 }
  0xbe   :  { %572 = vmatmul.mubr.f32.vlgmr.msra.gmra.mxu1 %v129_v10 }
 0x16e   :  { %v135_v22 = vpop.f32.mrf.mxu0 }
 0x170   :  { %v548_v23 = vpop.f32.mrf.mxu0 }
 0x172   :  { %v285_v24 = vpop.f32.mrf.mxu0 }
 0x174   :  { %v558_v25 = vpop.f32.mrf.mxu0 }
 0x176   :  { %v211_v26 = vpop.f32.mrf.mxu1 }
 0x177   :  { %v212_v27 = vadd.f32 %v211_v26, %v135_v22 }
 0x178   :  { %v553_v28 = vpop.f32.mrf.mxu1  ;;  %v433_v29 = vpop.f32.mrf.mxu0 }
 0x179   :  { %v286_v30 = vadd.f32 %v285_v24, %v212_v27 }
 0x17a   :  { %v359_v31 = vpop.f32.mrf.mxu1  ;;  %v568_v32 = vpop.f32.mrf.mxu0 }
 0x17b   :  { %v360_v33 = vadd.f32 %v359_v31, %v286_v30 }
 0x17c   :  { %v563_v34 = vpop.f32.mrf.mxu1 }
 0x17d   :  { %v434_v35 = vadd.f32 %v433_v29, %v360_v33 }
 0x17e   :  { %v505_v36 = vpop.f32.mrf.mxu1 }
 0x17f   :  { %v506_v37 = vadd.f32 %v505_v36, %v434_v35 }
 0x180   :  { %v573_v38 = vpop.f32.mrf.mxu1 }
 0x181   :  { %511 = vperm.xlu0 %580, %v506_v37  }
 0x1fc   :  { %v512_v39 = vpop.permute.xlu0 %511 }
 0x1fd   :  { %514 = vst [vmem:[#allocation7] sm:$0x1] %v512_v39 }
 0x1fe   :  { %632 = shalt.err (!%p629_p0)
}
 0x1ff   :  { %524 = dma.vmem_to_hbm [thread:$0]  %s522_s3, 16, %s703_s4, [#allocation4]  }
 0x200   :  { %645 = dma.done.wait [#allocation4], 16  }
 0x201   :  { %646 = vsyncadd [#allocation4], 4294967280 }
 0x202   :  { %528 = vsyncpa [#allocation3], 1 }
 0x203   :  { %529 = vsyncpa [#allocation6], 1 }
 0x204   :  { %530 = vsyncpa [#allocation4], 1 }

</bundles_post_ra>
